<compile_context>
chip_gen: v5e
topology: v5e:2x2
jax: 0.10.0
libtpu: 0.0.40
codegen_flags: <defaults>
</compile_context>

<pallas_src>
import jax
import jax.numpy as jnp
from jax.experimental import pallas as pl
from jax.experimental.pallas import tpu as pltpu


def _mlp_kernel(x_ref, w1t_ref, b1_ref, w2t_ref, b2_ref, o_ref):
    # x_ref  : (C_in,  TN)   one tile of pixels, channel-major
    # w1t_ref: (H1,   C_in)  = W1^T  (resident, constant index_map)
    # b1_ref : (H1,   1)
    # w2t_ref: (C_out, H1)   = W2^T
    # b2_ref : (C_out, 1)
    # o_ref  : (C_out, TN)   lane-dense output tile
    x = x_ref[...].astype(jnp.float32)          # no-op for f32; upcast if bf16-streamed
    h = jnp.dot(w1t_ref[...], x, preferred_element_type=jnp.float32)
    h = jnp.maximum(h + b1_ref[...], 0.0)
    y = jnp.dot(w2t_ref[...], h, preferred_element_type=jnp.float32)
    y = y + b2_ref[...]
    o_ref[...] = y.astype(o_ref.dtype)


def input_mlp_pallas(x_nchw, w1, b1, w2, b2, *, tile_n=2048, stream_dtype=None):
    """x_nchw: (B, C, H, W).  w1: (C_in, H1), b1: (H1,), w2: (H1, C_out), b2: (C_out,).

    Returns (B, C_out, H, W).  `stream_dtype=jnp.bfloat16` halves activation HBM
    traffic (recommended on v6e/v7x); accumulation is always f32.
    """
    B, C, H, W = x_nchw.shape
    c_in, h1 = w1.shape
    c_out = w2.shape[1]
    assert C == c_in

    n_pix = H * W
    # Channel-major view: pure reshape, zero transposes, zero extra HBM copies.
    x3 = x_nchw.reshape(B, C, n_pix)
    out_dtype = x_nchw.dtype
    if stream_dtype is not None:
        x3 = x3.astype(stream_dtype)
        out_dtype = stream_dtype

    # Tiny one-time weight transposes so the kernel does W^T @ x directly.
    w1t = jnp.asarray(w1).T                 # (H1, C_in)
    w2t = jnp.asarray(w2).T                 # (C_out, H1)
    b1c = jnp.asarray(b1).reshape(h1, 1)
    b2c = jnp.asarray(b2).reshape(c_out, 1)

    # Pixel-tile sizing: full extent when small, else a multiple of 128 with a
    # ragged (masked) tail handled by Pallas. No jnp.pad copy.
    if n_pix <= tile_n:
        tn = n_pix
        grid_n = 1
    else:
        assert tile_n % 128 == 0, "tile_n must be a multiple of 128"
        tn = tile_n
        grid_n = pl.cdiv(n_pix, tn)

    grid = (B, grid_n)

    # NOTE: weights/biases use a constant index_map, so Pallas keeps them
    # resident across grid steps.  (Single-buffering them via
    # pipeline_mode=pl.Buffered(1) is a further minor VMEM saving.)
    out3 = pl.pallas_call(
        _mlp_kernel,
        out_shape=jax.ShapeDtypeStruct((B, c_out, n_pix), out_dtype),
        grid_spec=pltpu.PrefetchScalarGridSpec(
            num_scalar_prefetch=0,
            grid=grid,
            in_specs=[
                pl.BlockSpec((None, c_in, tn), lambda b, j: (b, 0, j)),  # x tile
                pl.BlockSpec((h1, c_in), lambda b, j: (0, 0)),           # W1^T
                pl.BlockSpec((h1, 1), lambda b, j: (0, 0)),              # b1
                pl.BlockSpec((c_out, h1), lambda b, j: (0, 0)),          # W2^T
                pl.BlockSpec((c_out, 1), lambda b, j: (0, 0)),           # b2
            ],
            out_specs=pl.BlockSpec((None, c_out, tn), lambda b, j: (b, 0, j)),
        ),
        compiler_params=pltpu.CompilerParams(
            dimension_semantics=("parallel", "parallel"),
        ),
    )(x3, w1t, b1c, w2t, b2c)

    return out3.reshape(B, c_out, H, W)


def init_params(key, in_channels=16, out_channels=14, hidden_dims=(32,)):
    """PyTorch-style uniform(-1/sqrt(fan_in), 1/sqrt(fan_in)) init.

    Weights stored as (fan_in, fan_out) so reference does x @ W directly.
    """
    params = []
    prev = in_channels
    dims = list(hidden_dims) + [out_channels]
    for d in dims:
        key, kw, kb = jax.random.split(key, 3)
        bound = 1.0 / jnp.sqrt(jnp.float32(prev))
        w = jax.random.uniform(kw, (prev, d), jnp.float32, -bound, bound)
        b = jax.random.uniform(kb, (d,), jnp.float32, -bound, bound)
        params.append((w, b))
        prev = d
    return params


def reference_forward(x_nchw, params):
    """Pure-JAX reference of the PyTorch forward."""
    x = jnp.transpose(x_nchw, (0, 2, 3, 1))
    (w1, b1), (w2, b2) = params
    h = jnp.maximum(x @ w1 + b1, 0.0)
    y = h @ w2 + b2
    return jnp.transpose(y, (0, 3, 1, 2))


if __name__ == "__main__":
    key = jax.random.PRNGKey(0)
    key, kx = jax.random.split(key)

    B, C, H, W = 2, 16, 16, 16          # in_channels=16 per module default
    x = jax.random.normal(kx, (B, C, H, W), jnp.float32)

    params = init_params(key, in_channels=16, out_channels=14, hidden_dims=(32,))
    (w1, b1), (w2, b2) = params

    out = input_mlp_pallas(x, w1, b1, w2, b2)
    out = jax.block_until_ready(out)

    ref = reference_forward(x, params)
    assert out.shape == (B, 14, H, W), out.shape
    assert jnp.allclose(out, ref, atol=1e-4, rtol=1e-4), \
        float(jnp.max(jnp.abs(out - ref)))

    print("KERNEL_OK")
</pallas_src>

<mosaic_0001>
module attributes {stable_mosaic.version = 11 : i64} {
  func.func @_mlp_kernel(%arg0: i32, %arg1: i32, %arg2: memref<1x16x256xf32, #tpu.memory_space<vmem>>, %arg3: memref<32x16xf32, #tpu.memory_space<vmem>>, %arg4: memref<32x1xf32, #tpu.memory_space<vmem>>, %arg5: memref<14x32xf32, #tpu.memory_space<vmem>>, %arg6: memref<14x1xf32, #tpu.memory_space<vmem>>, %arg7: memref<1x14x256xf32, #tpu.memory_space<vmem>>) attributes {dimension_semantics = [#tpu.dimension_semantics<parallel>, #tpu.dimension_semantics<parallel>], iteration_bounds = array<i64: 2, 1>, scalar_prefetch = 0 : i64, scratch_operands = 0 : i64, tpu.core_type = #tpu.core_type<tc>, window_params = [{transform_indices = @transform_0, window_bounds = array<i64: 1, 16, 256>}, {pipeline_mode = #tpu.pipeline_mode<synchronous>, transform_indices = @transform_1, window_bounds = array<i64: 32, 16>}, {pipeline_mode = #tpu.pipeline_mode<synchronous>, transform_indices = @transform_2, window_bounds = array<i64: 32, 1>}, {pipeline_mode = #tpu.pipeline_mode<synchronous>, transform_indices = @transform_3, window_bounds = array<i64: 14, 32>}, {pipeline_mode = #tpu.pipeline_mode<synchronous>, transform_indices = @transform_4, window_bounds = array<i64: 14, 1>}, {transform_indices = @transform_5, window_bounds = array<i64: 1, 14, 256>}]} {
    %c0 = arith.constant 0 : index
    %c0_0 = arith.constant 0 : index
    %c0_1 = arith.constant 0 : index
    %0 = vector.load %arg2[%c0, %c0_0, %c0_1] : memref<1x16x256xf32, #tpu.memory_space<vmem>>, vector<1x16x256xf32>
    %1 = vector.shape_cast %0 : vector<1x16x256xf32> to vector<16x256xf32>
    %c0_2 = arith.constant 0 : index
    %c0_3 = arith.constant 0 : index
    %2 = vector.load %arg3[%c0_2, %c0_3] : memref<32x16xf32, #tpu.memory_space<vmem>>, vector<32x16xf32>
    %cst = arith.constant dense<0.000000e+00> : vector<32x256xf32>
    %3 = tpu.matmul %2, %1, %cst {dimension_numbers = #tpu.dot_dimension_numbers<[1], [0], [0], [1], [0, 0, 1, 1], [], []>} : vector<32x16xf32>, vector<16x256xf32>, vector<32x256xf32> -> vector<32x256xf32>
    %c0_4 = arith.constant 0 : index
    %c0_5 = arith.constant 0 : index
    %4 = vector.load %arg4[%c0_4, %c0_5] : memref<32x1xf32, #tpu.memory_space<vmem>>, vector<32x1xf32>
    %5 = vector.broadcast %4 : vector<32x1xf32> to vector<32x256xf32>
    %6 = arith.addf %3, %5 : vector<32x256xf32>
    %cst_6 = arith.constant 0.000000e+00 : f32
    %7 = vector.broadcast %cst_6 : f32 to vector<32x256xf32>
    %8 = arith.maximumf %6, %7 : vector<32x256xf32>
    %c0_7 = arith.constant 0 : index
    %c0_8 = arith.constant 0 : index
    %9 = vector.load %arg5[%c0_7, %c0_8] : memref<14x32xf32, #tpu.memory_space<vmem>>, vector<14x32xf32>
    %cst_9 = arith.constant dense<0.000000e+00> : vector<14x256xf32>
    %10 = tpu.matmul %9, %8, %cst_9 {dimension_numbers = #tpu.dot_dimension_numbers<[1], [0], [0], [1], [0, 0, 1, 1], [], []>} : vector<14x32xf32>, vector<32x256xf32>, vector<14x256xf32> -> vector<14x256xf32>
    %c0_10 = arith.constant 0 : index
    %c0_11 = arith.constant 0 : index
    %11 = vector.load %arg6[%c0_10, %c0_11] : memref<14x1xf32, #tpu.memory_space<vmem>>, vector<14x1xf32>
    %12 = vector.broadcast %11 : vector<14x1xf32> to vector<14x256xf32>
    %13 = arith.addf %10, %12 : vector<14x256xf32>
    %c0_12 = arith.constant 0 : index
    %c0_13 = arith.constant 0 : index
    %c0_14 = arith.constant 0 : index
    %14 = vector.load %arg7[%c0_12, %c0_13, %c0_14] : memref<1x14x256xf32, #tpu.memory_space<vmem>>, vector<1x14x256xf32>
    %15 = vector.shape_cast %14 : vector<1x14x256xf32> to vector<14x256xf32>
    %16 = vector.shape_cast %13 : vector<14x256xf32> to vector<1x14x256xf32>
    tpu.vector_store %arg7[%c0_12, %c0_13, %c0_14], %16 {strides = array<i32>} : memref<1x14x256xf32, #tpu.memory_space<vmem>>, vector<1x14x256xf32>,
    return
  }
  func.func @transform_0(%arg0: i32, %arg1: i32) -> (i32, i32, i32) {
    %c0_i32 = arith.constant 0 : i32
    %c0_i32_0 = arith.constant 0 : i32
    return %arg0, %c0_i32, %arg1 : i32, i32, i32
  }
  func.func @transform_1(%arg0: i32, %arg1: i32) -> (i32, i32) {
    %c0_i32 = arith.constant 0 : i32
    %c0_i32_0 = arith.constant 0 : i32
    %c0_i32_1 = arith.constant 0 : i32
    return %c0_i32, %c0_i32_0 : i32, i32
  }
  func.func @transform_2(%arg0: i32, %arg1: i32) -> (i32, i32) {
    %c0_i32 = arith.constant 0 : i32
    %c0_i32_0 = arith.constant 0 : i32
    %c0_i32_1 = arith.constant 0 : i32
    return %c0_i32, %c0_i32_0 : i32, i32
  }
  func.func @transform_3(%arg0: i32, %arg1: i32) -> (i32, i32) {
    %c0_i32 = arith.constant 0 : i32
    %c0_i32_0 = arith.constant 0 : i32
    %c0_i32_1 = arith.constant 0 : i32
    return %c0_i32, %c0_i32_0 : i32, i32
  }
  func.func @transform_4(%arg0: i32, %arg1: i32) -> (i32, i32) {
    %c0_i32 = arith.constant 0 : i32
    %c0_i32_0 = arith.constant 0 : i32
    %c0_i32_1 = arith.constant 0 : i32
    return %c0_i32, %c0_i32_0 : i32, i32
  }
  func.func @transform_5(%arg0: i32, %arg1: i32) -> (i32, i32, i32) {
    %c0_i32 = arith.constant 0 : i32
    %c0_i32_0 = arith.constant 0 : i32
    return %arg0, %c0_i32, %arg1 : i32, i32, i32
  }
}

</mosaic_0001>

<bundles_post_ra>
// kernel: tpu_custom_call.1
= control target key start
LH: loop header
LB: loop body
LE: loop exit
PB: predicated region body
PF: predicated region fallthrough
CT: control target
= control target key end

     0   :  { %s641_s18 = smov 0   ;;  %s643_s19 = smov 0   ;;  %s725_s0 = inlined_call_operand.vmem [shape: f32[2,16,256], index: 0, kind: input, shape index: {}]   ;;  %s726_s1 = inlined_call_operand.vmem [shape: f32[32,16], index: 1, kind: input, shape index: {}]   ;;  %s727_s2 = inlined_call_operand.vmem [shape: f32[32,1], index: 2, kind: input, shape index: {}]   ;;  %s728_s3 = inlined_call_operand.vmem [shape: f32[14,32], index: 3, kind: input, shape index: {}]   ;;  %s729_s4 = inlined_call_operand.vmem [shape: f32[14,1], index: 4, kind: input, shape index: {}]   ;;  %s730_s5 = inlined_call_operand.vmem [shape: f32[2,14,256], index: 5, kind: output, shape index: {}]  }
   0x1   :  { %s645_s20 = smov 0  }
   0x2 LB: > { %s27_s21 = sadd.s32 1, %s604_s19  ;;  %p537_p0 = scmp.ge.s32.totalorder %s608_s20, 1  ;;  %s608_s20 = sphi %s645_s20, %s15_s20   ;;  %s604_s19 = sphi %s643_s19, %s732_s19   ;;  %s600_s18 = sphi %s641_s18, %s731_s18  }
   0x3   : > { %p29_p1 = scmp.ge.s32.totalorder %s27_s21, 2  ;;  %p208_p2 = scmp.lt.s32.totalorder %s608_s20, 3 }
   0x5   : > { %s734_s21 = smov (%p29_p1, %s27_s21), 0  ;;  %p209_p3 = pnand %p537_p0, %p208_p2 }
   0x6   : > { %p245_p4 = scmp.lt.s32.totalorder (!%p209_p3), %s600_s18, 1 }
   0x7   : > { %212 = sbr.rel (%p209_p3) target bundleno = 324 (0x144), region = 40 }
   0xc   : > { %v273_v0 = vld [vmem:[%s727_s2 + $0x8] sm:$0xff]  ;;  %v610_v1 = vmov 0   ;;  %v275_v2 = vld [vmem:[%s727_s2 + $0x18] sm:$0xff]  ;;  %s736_s18 = smov (!%p245_p4, %s600_s18), 1  ;;  %v268_v7 = vld [vmem:[%s726_s1] sm:$0xff]  ;;  %vm296_vm0 = vcmask 130048  }
   0xd   : > { %584 = vset.pattern.permute.xlu1 %v610_v1  ;;  %583 = vset.pattern.permute.xlu0 %v610_v1  ;;  %s556_s26 = sshll.u32 %s736_s18, 5  ;;  %v272_v8 = vld [vmem:[%s727_s2] sm:$0xff]  ;;  %v274_v9 = vld [vmem:[%s727_s2 + $0x10] sm:$0xff]  ;;  %v269_v10 = vld [vmem:[%s726_s1 + $0x8] sm:$0xff]  ;;  %vm389_vm1 = vcmask 261120  }
   0xe   : > { %283 = vperm.xlu1 %584, %v273_v0   ;;  %293 = vperm.xlu0 %583, %v275_v2   ;;  %s252_s29 = scalar_lea.vmem %s725_s0, %s556_s26  ;;  %v270_v11 = vld [vmem:[%s726_s1 + $0x10] sm:$0xff]  ;;  %v271_v12 = vld [vmem:[%s726_s1 + $0x18] sm:$0xff]  ;;  %v377_v18 = vld [vmem:[%s729_s4] sm:$0xff]  ;;  %s262_s7 = scalar_lea.vmem %s730_s5, %s556_s26 }
   0xf   : > { %585 = vset.pattern.permute.xlu2 %v610_v1  ;;  %v266_v3 = vld [vmem:[%s252_s29 + $0x10] sm:$0xff]  ;;  %v267_v4 = vld [vmem:[%s252_s29 + $0x18] sm:$0xff]  ;;  %v264_v5 = vld [vmem:[%s252_s29] sm:$0xff] }
  0x10   : > { %323 = vmatpush.msra.mxu0 %v266_v3  ;;  %352 = vmatpush.msra.mxu1 %v267_v4  ;;  %v265_v6 = vld [vmem:[%s252_s29 + $0x8] sm:$0xff]  ;;  %v375_v43 = vld [vmem:[%s728_s3] sm:$0xff] }
  0x11   : > { %381 = vperm.xlu2 %585, %v377_v18   ;;  %v378_v22 = vld [vmem:[%s729_s4 + $0x8] sm:$0x3f] }
  0x12   : > { %324 = vmatpush.msra.mxu0 %v264_v5  ;;  %353 = vmatpush.msra.mxu1 %v265_v6  ;;  %v376_v44 = vld [vmem:[%s728_s3 + $0x8] sm:$0x3f] }
  0x13   : > { %542 = vmatmul.msk.f32.vlgmr.msra.gmra.mxu0 %vm296_vm0, %v268_v7  ;;  %546 = vmatmul.msk.f32.vlgmr.msra.gmra.mxu1 %vm296_vm0, %v268_v7 }
  0x16   : > { %278 = vperm.xlu1 %584, %v272_v8   ;;  %288 = vperm.xlu0 %583, %v274_v9  }
  0x19   : > { %386 = vperm.xlu2 %585, %v378_v22  }
  0x1b   : > { %543 = vmatmul.msk.f32.gmra.mxu0 %vm296_vm0, %v269_v10  ;;  %547 = vmatmul.msk.f32.gmra.mxu1 %vm296_vm0, %v269_v10 }
  0x23   : > { %544 = vmatmul.msk.f32.gmra.mxu0 %vm296_vm0, %v270_v11  ;;  %548 = vmatmul.msk.f32.gmra.mxu1 %vm296_vm0, %v270_v11 }
  0x2b   : > { %545 = vmatmul.msk.f32.gmra.mxu0 %vm296_vm0, %v271_v12  ;;  %549 = vmatmul.msk.f32.gmra.mxu1 %vm296_vm0, %v271_v12 }
  0x6b   : > { %v382_v45 = vpop.permute.xlu2 %381 }
  0x73   : > { %v387_v50 = vpop.permute.xlu2 %386 }
  0x80   : > { %v294_v17 = vpop.permute.xlu0 %293  ;;  %v284_v19 = vpop.permute.xlu1 %283 }
  0x88   : > { %v289_v23 = vpop.permute.xlu0 %288  ;;  %v279_v30 = vpop.permute.xlu1 %278 }
  0x90   : > { %v326_v13 = vpop.f32.mrf.mxu0  ;;  %v355_v14 = vpop.f32.mrf.mxu1 }
  0x91   : > { %v327_v35 = vadd.f32 %v326_v13, %v279_v30  ;;  %v356_v36 = vadd.f32 %v355_v14, %v279_v30 }
  0x93   : > { %v367_v41 = vmax.f32 %v327_v35, 0.0  ;;  %v368_v42 = vmax.f32 %v356_v36, 0.0 }
  0x98   : > { %v329_v15 = vpop.f32.mrf.mxu0  ;;  %v358_v16 = vpop.f32.mrf.mxu1 }
  0x99   : > { %v330_v31 = vadd.f32 %v329_v15, %v284_v19  ;;  %v359_v32 = vadd.f32 %v358_v16, %v284_v19 }
  0x9b   : > { %v369_v39 = vmax.f32 %v330_v31, 0.0  ;;  %v370_v40 = vmax.f32 %v359_v32, 0.0 }
  0xa0   : > { %v332_v20 = vpop.f32.mrf.mxu0  ;;  %v361_v21 = vpop.f32.mrf.mxu1 }
  0xa1   : > { %v333_v26 = vadd.f32 %v332_v20, %v289_v23  ;;  %v362_v27 = vadd.f32 %v361_v21, %v289_v23 }
  0xa3   : > { %v371_v37 = vmax.f32 %v333_v26, 0.0  ;;  %v372_v38 = vmax.f32 %v362_v27, 0.0 }
  0xa8   : > { %v335_v24 = vpop.f32.mrf.mxu0  ;;  %v364_v25 = vpop.f32.mrf.mxu1 }
  0xa9   : > { %v336_v28 = vadd.f32 %v335_v24, %v294_v17  ;;  %v365_v29 = vadd.f32 %v364_v25, %v294_v17 }
  0xab   : > { %v373_v33 = vmax.f32 %v336_v28, 0.0  ;;  %v374_v34 = vmax.f32 %v365_v29, 0.0 }
  0xad   : > { %408 = vmatpush.msra.mxu2 %v373_v33  ;;  %431 = vmatpush.msra.mxu3 %v374_v34 }
  0xaf   : > { %409 = vmatpush.msra.mxu2 %v371_v37  ;;  %432 = vmatpush.msra.mxu3 %v372_v38 }
  0xb1   : > { %410 = vmatpush.msra.mxu2 %v369_v39  ;;  %433 = vmatpush.msra.mxu3 %v370_v40 }
  0xb3   : > { %411 = vmatpush.msra.mxu2 %v367_v41  ;;  %434 = vmatpush.msra.mxu3 %v368_v42 }
  0xb4   : > { %550 = vmatmul.msk.f32.vlgmr.msra.gmra.mxu2 %vm389_vm1, %v375_v43  ;;  %552 = vmatmul.msk.f32.vlgmr.msra.gmra.mxu3 %vm389_vm1, %v375_v43 }
  0xbc   : > { %551 = vmatmul.msk.f32.gmra.mxu2 %vm389_vm1, %v376_v44  ;;  %553 = vmatmul.msk.f32.gmra.mxu3 %vm389_vm1, %v376_v44 }
 0x137   : > { %v413_v46 = vpop.f32.mrf.mxu2  ;;  %v436_v47 = vpop.f32.mrf.mxu3 }
 0x138   : > { %v414_v48 = vadd.f32 %v413_v46, %v382_v45  ;;  %v437_v49 = vadd.f32 %v436_v47, %v382_v45 }
 0x13a   : > { %442 = vst [vmem:[%s262_s7] sm:$0xff] %v414_v48 }
 0x13b   : > { %443 = vst [vmem:[%s262_s7 + $0x8] sm:$0xff] %v437_v49 }
 0x13f   : > { %v416_v51 = vpop.f32.mrf.mxu2  ;;  %v439_v52 = vpop.f32.mrf.mxu3 }
 0x140   : > { %v417_v53 = vadd.f32 %v416_v51, %v387_v50  ;;  %v440_v54 = vadd.f32 %v439_v52, %v387_v50 }
 0x142   : > { %444 = vst [vmem:[%s262_s7 + $0x10] sm:$0x3f] %v417_v53 }
 0x143   : > { %445 = vst [vmem:[%s262_s7 + $0x18] sm:$0x3f] %v440_v54 }
 0x144 PF: > { %s15_s20 = sadd.s32 1, %s608_s20   ;;  %s731_s18 = smov %s604_s19 }
 0x145   : > { %p12_p5 = scmp.ge.s32.totalorder %s15_s20, 4   ;;  %s732_s19 = smov %s734_s21 }
 0x147   :  { %14 = sbr.rel (!%p12_p5) target bundleno = 2 (0x2), region = 70 }

</bundles_post_ra>
